<compile_context>
chip_gen: v7x
topology: tpu7x:2x2x1
jax: 0.10.0
libtpu: 0.0.40
codegen_flags: <defaults>
</compile_context>

<pallas_src>
import jax
import jax.numpy as jnp
from jax.experimental import pallas as pl
from jax.experimental.pallas import tpu as pltpu


def pack_mha_params(w_heads, b_heads, w_final, b_final):
    """One-time layout plumbing. Call once when the weights are created/updated.

    w_heads: (H, D, D)  PyTorch Linear weight layout (out, in) per head
    b_heads: (H, D)
    w_final: (D, H*D)   PyTorch Linear weight layout (out, in)
    b_final: (D,)
    """
    H, D, _ = w_heads.shape
    HD = H * D

    # logits_all = x @ w_all + b_all, with w_all[k, h*D + j] = w_heads[h, j, k]
    w_all = jnp.transpose(w_heads, (2, 0, 1)).reshape(D, HD)     # (D, HD)
    b_all = b_heads.reshape(1, HD).astype(jnp.float32)           # (1, HD)
    wf_t = jnp.transpose(w_final)                                # (HD, D)
    bf2d = b_final.reshape(1, D).astype(jnp.float32)             # (1, D)

    # Static lane-layout helpers (constants, resident in VMEM):
    col = jnp.arange(HD)
    # x_tiled = x @ rep_eye  ->  x_tiled[:, h*D + j] = x[:, j]
    rep_eye = (col[None, :] % D == jnp.arange(D)[:, None]).astype(w_all.dtype)   # (D, HD)
    # s = e @ head_ones      ->  per-head sums, broadcast across each head's D lanes
    head_ones = (col[:, None] // D == col[None, :] // D).astype(jnp.float32)     # (HD, HD)

    return dict(w_all=w_all, b_all=b_all, wf_t=wf_t, bf=bf2d,
                rep_eye=rep_eye, head_ones=head_ones, H=H, D=D)


def _mha_fused_kernel(x_ref, w_all_ref, b_all_ref, wf_t_ref, bf_ref,
                      rep_eye_ref, head_ones_ref, o_ref):
    xb = x_ref[...]                                    # (bb, D), input dtype (f32/bf16)

    # All head logits in one MXU pass, f32 accumulate: (bb, HD), lane-dense.
    logits = jnp.dot(xb, w_all_ref[...], preferred_element_type=jnp.float32)
    logits = logits + b_all_ref[...]

    # Global per-row max: per-head shift-invariant, and logits - m <= 0 so exp
    # cannot overflow. (Per-head max would need a (bb,H,D) relayout; skipped.)
    m = jnp.max(logits, axis=-1, keepdims=True)
    e = jnp.exp(logits - m)                            # (bb, HD) f32, full-lane EUP

    # Per-head denominators already broadcast across each head's D lanes via a
    # block-diagonal-ones matmul (MXU), instead of a reshape + axis reduce.
    s = jnp.dot(e, head_ones_ref[...], preferred_element_type=jnp.float32)
    p = e * pl.reciprocal(s, approx=True)              # per-head softmax, (bb, HD)

    # Gate with x tiled across heads (stacked-identity matmul; no lane concat).
    x_tiled = jnp.dot(xb, rep_eye_ref[...], preferred_element_type=jnp.float32)
    gated = p * x_tiled                                # (bb, HD), stays lane-dense

    # Final projection: (bb, HD) x (HD, D) + bias.
    wf_t_v = wf_t_ref[...]
    out = jnp.dot(gated.astype(wf_t_v.dtype), wf_t_v,
                  preferred_element_type=jnp.float32) + bf_ref[...]
    o_ref[...] = out.astype(o_ref.dtype)


def multi_head_attention(x, params, *, block_b=None):
    """x: (B, D); params: output of pack_mha_params. Returns (B, D)."""
    B, D = x.shape
    H = params["H"]
    HD = H * D

    # Batch tiling: whole batch as one tile up to 512 rows; otherwise 512-row
    # tiles (multiple of 8) with a partial last tile handled by Pallas.
    # Sweepable via block_b (512/1024/2048 all fit VMEM on v5e/v6e/v7x).
    if block_b is None:
        block_b = B if B <= 512 else 512
    if block_b < B:
        block_b = ((block_b + 7) // 8) * 8             # keep (8,·) tiling legal
    block_b = min(block_b, B) if block_b >= B else block_b
    grid = (pl.cdiv(B, block_b),)

    # NOTE(v7x): resident-weights strategy assumes D*HD stays small; for D>=512
    # switch stacked weights to bf16 and/or add an "arbitrary" HD-reduction axis.
    grid_spec = pltpu.PrefetchScalarGridSpec(
        num_scalar_prefetch=0,
        grid=grid,
        in_specs=[
            pl.BlockSpec((block_b, D), lambda i: (i, 0)),   # x (batch-tiled, streamed)
            pl.BlockSpec((D, HD), lambda i: (0, 0)),        # stacked head weights (resident)
            pl.BlockSpec((1, HD), lambda i: (0, 0)),        # stacked head biases (resident)
            pl.BlockSpec((HD, D), lambda i: (0, 0)),        # final weight^T (resident)
            pl.BlockSpec((1, D), lambda i: (0, 0)),         # final bias (resident)
            pl.BlockSpec((D, HD), lambda i: (0, 0)),        # stacked identity (resident)
            pl.BlockSpec((HD, HD), lambda i: (0, 0)),       # block-diag ones (resident)
        ],
        out_specs=pl.BlockSpec((block_b, D), lambda i: (i, 0)),
    )

    return pl.pallas_call(
        _mha_fused_kernel,
        out_shape=jax.ShapeDtypeStruct((B, D), x.dtype),
        grid_spec=grid_spec,
        compiler_params=pltpu.CompilerParams(
            dimension_semantics=("parallel",)            # shards across v7x's 2 TCs
        ),
    )(x, params["w_all"], params["b_all"], params["wf_t"], params["bf"],
      params["rep_eye"], params["head_ones"])


def reference(x, w_heads, b_heads, w_final, b_final):
    heads = []
    for h in range(w_heads.shape[0]):
        logits = x @ w_heads[h].T + b_heads[h]
        p = jax.nn.softmax(logits, axis=1)
        heads.append(p * x)
    concat = jnp.concatenate(heads, axis=1)
    return concat @ w_final.T + b_final


if __name__ == "__main__":
    B, D, H = 8, 32, 4

    key = jax.random.PRNGKey(0)
    kx, kw, kb, kwf, kbf = jax.random.split(key, 5)

    # Deterministic "PyTorch-style" uniform init (bound = 1/sqrt(fan_in)).
    bound_h = 1.0 / jnp.sqrt(jnp.float32(D))
    bound_f = 1.0 / jnp.sqrt(jnp.float32(H * D))

    x = jax.random.normal(kx, (B, D), dtype=jnp.float32)
    w_heads = jax.random.uniform(kw, (H, D, D), jnp.float32, -bound_h, bound_h)
    b_heads = jax.random.uniform(kb, (H, D), jnp.float32, -bound_h, bound_h)
    w_final = jax.random.uniform(kwf, (D, H * D), jnp.float32, -bound_f, bound_f)
    b_final = jax.random.uniform(kbf, (D,), jnp.float32, -bound_f, bound_f)

    # One-time weight repack (hoisted out of the per-call path).
    params = pack_mha_params(w_heads, b_heads, w_final, b_final)

    out = multi_head_attention(x, params)
    out = jax.block_until_ready(out)

    ref = reference(x, w_heads, b_heads, w_final, b_final)
    assert out.shape == (B, D)
    # Slightly looser tolerance: softmax denominator uses the EUP approximate
    # reciprocal (pl.reciprocal(approx=True)).
    assert jnp.allclose(out, ref, atol=1e-3, rtol=1e-3), "mismatch vs reference"

    print("KERNEL_OK")
</pallas_src>

<mosaic_0001>
module attributes {stable_mosaic.version = 11 : i64} {
  func.func @_mha_fused_kernel(%arg0: i32, %arg1: memref<8x32xf32, #tpu.memory_space<vmem>>, %arg2: memref<32x128xf32, #tpu.memory_space<vmem>>, %arg3: memref<1x128xf32, #tpu.memory_space<vmem>>, %arg4: memref<128x32xf32, #tpu.memory_space<vmem>>, %arg5: memref<1x32xf32, #tpu.memory_space<vmem>>, %arg6: memref<32x128xf32, #tpu.memory_space<vmem>>, %arg7: memref<128x128xf32, #tpu.memory_space<vmem>>, %arg8: memref<8x32xf32, #tpu.memory_space<vmem>>) attributes {dimension_semantics = [#tpu.dimension_semantics<parallel>], iteration_bounds = array<i64: 1>, scalar_prefetch = 0 : i64, scratch_operands = 0 : i64, tpu.core_type = #tpu.core_type<tc>, window_params = [{transform_indices = @transform_0, window_bounds = array<i64: 8, 32>}, {pipeline_mode = #tpu.pipeline_mode<synchronous>, transform_indices = @transform_1, window_bounds = array<i64: 32, 128>}, {pipeline_mode = #tpu.pipeline_mode<synchronous>, transform_indices = @transform_2, window_bounds = array<i64: 1, 128>}, {pipeline_mode = #tpu.pipeline_mode<synchronous>, transform_indices = @transform_3, window_bounds = array<i64: 128, 32>}, {pipeline_mode = #tpu.pipeline_mode<synchronous>, transform_indices = @transform_4, window_bounds = array<i64: 1, 32>}, {pipeline_mode = #tpu.pipeline_mode<synchronous>, transform_indices = @transform_5, window_bounds = array<i64: 32, 128>}, {pipeline_mode = #tpu.pipeline_mode<synchronous>, transform_indices = @transform_6, window_bounds = array<i64: 128, 128>}, {transform_indices = @transform_7, window_bounds = array<i64: 8, 32>}]} {
    %c0 = arith.constant 0 : index
    %c0_0 = arith.constant 0 : index
    %0 = vector.load %arg1[%c0, %c0_0] : memref<8x32xf32, #tpu.memory_space<vmem>>, vector<8x32xf32>
    %c0_1 = arith.constant 0 : index
    %c0_2 = arith.constant 0 : index
    %1 = vector.load %arg2[%c0_1, %c0_2] : memref<32x128xf32, #tpu.memory_space<vmem>>, vector<32x128xf32>
    %cst = arith.constant dense<0.000000e+00> : vector<8x128xf32>
    %2 = tpu.matmul %0, %1, %cst {dimension_numbers = #tpu.dot_dimension_numbers<[1], [0], [0], [1], [0, 0, 1, 1], [], []>} : vector<8x32xf32>, vector<32x128xf32>, vector<8x128xf32> -> vector<8x128xf32>
    %c0_3 = arith.constant 0 : index
    %c0_4 = arith.constant 0 : index
    %3 = vector.load %arg3[%c0_3, %c0_4] : memref<1x128xf32, #tpu.memory_space<vmem>>, vector<1x128xf32>
    %4 = vector.broadcast %3 : vector<1x128xf32> to vector<8x128xf32>
    %5 = arith.addf %2, %4 : vector<8x128xf32>
    %cst_5 = arith.constant dense<0xFF800000> : vector<8xf32>
    %6 = vector.multi_reduction <maximumf>, %5, %cst_5 [1] : vector<8x128xf32> to vector<8xf32>
    %7 = vector.shape_cast %6 : vector<8xf32> to vector<8x1xf32>
    %8 = vector.broadcast %7 : vector<8x1xf32> to vector<8x128xf32>
    %9 = arith.subf %5, %8 : vector<8x128xf32>
    %10 = math.exp %9 : vector<8x128xf32>
    %c0_6 = arith.constant 0 : index
    %c0_7 = arith.constant 0 : index
    %11 = vector.load %arg7[%c0_6, %c0_7] : memref<128x128xf32, #tpu.memory_space<vmem>>, vector<128x128xf32>
    %cst_8 = arith.constant dense<0.000000e+00> : vector<8x128xf32>
    %12 = tpu.matmul %10, %11, %cst_8 {dimension_numbers = #tpu.dot_dimension_numbers<[1], [0], [0], [1], [0, 0, 1, 1], [], []>} : vector<8x128xf32>, vector<128x128xf32>, vector<8x128xf32> -> vector<8x128xf32>
    %13 = tpu.reciprocal %12 {approx = true} : vector<8x128xf32> -> vector<8x128xf32>
    %14 = arith.mulf %10, %13 : vector<8x128xf32>
    %c0_9 = arith.constant 0 : index
    %c0_10 = arith.constant 0 : index
    %15 = vector.load %arg6[%c0_9, %c0_10] : memref<32x128xf32, #tpu.memory_space<vmem>>, vector<32x128xf32>
    %cst_11 = arith.constant dense<0.000000e+00> : vector<8x128xf32>
    %16 = tpu.matmul %0, %15, %cst_11 {dimension_numbers = #tpu.dot_dimension_numbers<[1], [0], [0], [1], [0, 0, 1, 1], [], []>} : vector<8x32xf32>, vector<32x128xf32>, vector<8x128xf32> -> vector<8x128xf32>
    %17 = arith.mulf %14, %16 : vector<8x128xf32>
    %c0_12 = arith.constant 0 : index
    %c0_13 = arith.constant 0 : index
    %18 = vector.load %arg4[%c0_12, %c0_13] : memref<128x32xf32, #tpu.memory_space<vmem>>, vector<128x32xf32>
    %cst_14 = arith.constant dense<0.000000e+00> : vector<8x32xf32>
    %19 = tpu.matmul %17, %18, %cst_14 {dimension_numbers = #tpu.dot_dimension_numbers<[1], [0], [0], [1], [0, 0, 1, 1], [], []>} : vector<8x128xf32>, vector<128x32xf32>, vector<8x32xf32> -> vector<8x32xf32>
    %c0_15 = arith.constant 0 : index
    %c0_16 = arith.constant 0 : index
    %20 = vector.load %arg5[%c0_15, %c0_16] : memref<1x32xf32, #tpu.memory_space<vmem>>, vector<1x32xf32>
    %21 = vector.broadcast %20 : vector<1x32xf32> to vector<8x32xf32>
    %22 = arith.addf %19, %21 : vector<8x32xf32>
    %c0_17 = arith.constant 0 : index
    %c0_18 = arith.constant 0 : index
    %23 = vector.load %arg8[%c0_17, %c0_18] : memref<8x32xf32, #tpu.memory_space<vmem>>, vector<8x32xf32>
    tpu.vector_store %arg8[%c0_17, %c0_18], %22 {strides = array<i32>} : memref<8x32xf32, #tpu.memory_space<vmem>>, vector<8x32xf32>,
    return
  }
  func.func @transform_0(%arg0: i32) -> (i32, i32) {
    %c0_i32 = arith.constant 0 : i32
    %c0_i32_0 = arith.constant 0 : i32
    return %arg0, %c0_i32 : i32, i32
  }
  func.func @transform_1(%arg0: i32) -> (i32, i32) {
    %c0_i32 = arith.constant 0 : i32
    %c0_i32_0 = arith.constant 0 : i32
    %c0_i32_1 = arith.constant 0 : i32
    return %c0_i32, %c0_i32_0 : i32, i32
  }
  func.func @transform_2(%arg0: i32) -> (i32, i32) {
    %c0_i32 = arith.constant 0 : i32
    %c0_i32_0 = arith.constant 0 : i32
    %c0_i32_1 = arith.constant 0 : i32
    return %c0_i32, %c0_i32_0 : i32, i32
  }
  func.func @transform_3(%arg0: i32) -> (i32, i32) {
    %c0_i32 = arith.constant 0 : i32
    %c0_i32_0 = arith.constant 0 : i32
    %c0_i32_1 = arith.constant 0 : i32
    return %c0_i32, %c0_i32_0 : i32, i32
  }
  func.func @transform_4(%arg0: i32) -> (i32, i32) {
    %c0_i32 = arith.constant 0 : i32
    %c0_i32_0 = arith.constant 0 : i32
    %c0_i32_1 = arith.constant 0 : i32
    return %c0_i32, %c0_i32_0 : i32, i32
  }
  func.func @transform_5(%arg0: i32) -> (i32, i32) {
    %c0_i32 = arith.constant 0 : i32
    %c0_i32_0 = arith.constant 0 : i32
    %c0_i32_1 = arith.constant 0 : i32
    return %c0_i32, %c0_i32_0 : i32, i32
  }
  func.func @transform_6(%arg0: i32) -> (i32, i32) {
    %c0_i32 = arith.constant 0 : i32
    %c0_i32_0 = arith.constant 0 : i32
    %c0_i32_1 = arith.constant 0 : i32
    return %c0_i32, %c0_i32_0 : i32, i32
  }
  func.func @transform_7(%arg0: i32) -> (i32, i32) {
    %c0_i32 = arith.constant 0 : i32
    %c0_i32_0 = arith.constant 0 : i32
    return %arg0, %c0_i32 : i32, i32
  }
}

</mosaic_0001>

<bundles_post_ra>
// kernel: tpu_custom_call.1
= control target key start
LH: loop header
LB: loop body
LE: loop exit
PB: predicated region body
PF: predicated region fallthrough
CT: control target
= control target key end

     0   :  { %12 = vsyncpa [#allocation3], 0  ;;  %s886_s0 = inlined_call_operand.vmem [shape: f32[8,32], index: 0, kind: input, shape index: {}]   ;;  %s887_s1 = inlined_call_operand.vmem [shape: f32[32,128], index: 1, kind: input, shape index: {}]   ;;  %s888_s2 = inlined_call_operand.vmem [shape: f32[1,128], index: 2, kind: input, shape index: {}]   ;;  %s889_s3 = inlined_call_operand.vmem [shape: f32[128,32], index: 3, kind: input, shape index: {}]   ;;  %s890_s4 = inlined_call_operand.vmem [shape: f32[1,32], index: 4, kind: input, shape index: {}]   ;;  %s891_s5 = inlined_call_operand.hbm [shape: f32[32,128], index: 5, kind: input, shape index: {}]   ;;  %s892_s6 = inlined_call_operand.vmem [shape: f32[128,128], index: 6, kind: input, shape index: {}]   ;;  %s893_s7 = inlined_call_operand.hbm [shape: f32[8,32], index: 7, kind: output, shape index: {}]  }
   0x1   :  { %13 = vsyncpa [#allocation4], 0  ;;  %s663_s24 = smov [#allocation2]   ;;  %s615_s28 = scalar_lea.hbm %s891_s5, 512 }
   0x2   :  { %s29_s25 = sshll.u32 %s663_s24, 4  ;;  %p616_p0 = scmp.ne.s32.totalorder %s891_s5, %s615_s28  ;;  %s30_s25 = int_to_ptr.vmem [resolvable:$true] %s29_s25 }
   0x3   :  { %p619_p1 = scmp.lt.u32.totalorder %s615_s28, %s891_s5 }
   0x5   :  { %p621_p2 = pnand %p619_p1, %p616_p0 }
   0x7   :  { %624 = shalt.err (!%p621_p2)
}
   0x8   :  { %s625_s10 = scalar_lea.vmem %s30_s25, 512  ;;  %p630_p4 = scmp.lt.s32.totalorder %s30_s25, %s30_s25 }
   0x9   :  { %p626_p3 = scmp.ne.s32.totalorder %s30_s25, %s625_s10  ;;  %p631_p5 = scmp.lt.s32.totalorder %s625_s10, %s625_s10 }
   0xb   :  { %p632_p6 = por %p631_p5, %p630_p4 }
   0xd   :  { %p633_p7 = pnand %p632_p6, %p626_p3 }
   0xf   :  { %636 = shalt.err (!%p633_p7)
}
  0x10   :  { %s664_s11 = smov 128   ;;  %s665_s12 = smov 8  }
  0x11   :  { %35 = dma.hbm_to_vmem [thread:$0]  %s891_s5, 512, %s30_s25, [#allocation3], %s664_s11, %s664_s11, %s665_s12  }
  0x12   :  { %659 = dma.done.wait [#allocation3], 512  }
  0x13   :  { %660 = vsyncadd [#allocation3], 4294966784  ;;  %v666_v0 = vmov 0.0|0.0   ;;  %vm667_vm0 = vmmov 0   ;;  %v668_v1 = vmov 0.0   ;;  %v42_v2 = vld [vmem:[%s887_s1] sm:$0xff] }
  0x14   :  { %544 = vmatprep.subr.bf16.mxu1 %v666_v0  ;;  %460 = vmatprep.mubr.msk.f32.mxu1 %vm667_vm0, %v668_v1  ;;  %v43_v3 = vld [vmem:[%s887_s1 + $0x8] sm:$0xff]  ;;  %v44_v4 = vld [vmem:[%s887_s1 + $0x10] sm:$0xff]  ;;  %v45_v6 = vld [vmem:[%s887_s1 + $0x18] sm:$0xff]  ;;  %vm53_vm1 = vcmask 261120   ;;  %s669_s11 = smov [#allocation5]  }
  0x15   :  { %574 = vmatprep.subr.bf16.mxu0 %v666_v0  ;;  %506 = vmatprep.mubr.msk.f32.mxu0 %vm667_vm0, %v668_v1  ;;  %v545_v5 = vpack.c.bf16 %v43_v3, %v42_v2  ;;  %v548_v7 = vpack.c.bf16 %v45_v6, %v44_v4  ;;  %v744_v8 = vld [vmem:[%s886_s0] sm:$0xff]  ;;  %v133_v10 = vld [vmem:[%s892_s6 + $0x8] sm:$0xff]  ;;  %v134_v11 = vld [vmem:[%s892_s6 + $0x10] sm:$0xff]  ;;  %s395_s12 = sshll.u32 %s669_s11, 4  ;;  %s396_s12 = int_to_ptr.vmem [resolvable:$true] %s395_s12 }
  0x16   :  { %v132_v9 = vld [vmem:[%s892_s6] sm:$0xff]  ;;  %v135_v13 = vld [vmem:[%s892_s6 + $0x18] sm:$0xff]  ;;  %v137_v16 = vld [vmem:[%s892_s6 + $0x28] sm:$0xff]  ;;  %p642_p9 = scmp.lt.s32.totalorder %s396_s12, %s396_s12 }
  0x17   :  { %546 = vmatpush3.bf16.msra.mxu1 %v545_v5  ;;  %v551_v12 = vpack.c.bf16 %v133_v10, %v132_v9  ;;  %v554_v14 = vpack.c.bf16 %v135_v13, %v134_v11  ;;  %v136_v15 = vld [vmem:[%s892_s6 + $0x20] sm:$0xff]  ;;  %v138_v18 = vld [vmem:[%s892_s6 + $0x30] sm:$0xff]  ;;  %v139_v19 = vld [vmem:[%s892_s6 + $0x38] sm:$0xff] }
  0x18   :  { %547 = vmatprep.subr.bf16.mxu1 %v666_v0  ;;  %v557_v17 = vpack.c.bf16 %v137_v16, %v136_v15  ;;  %v560_v20 = vpack.c.bf16 %v139_v19, %v138_v18  ;;  %v404_v21 = vld [vmem:[%s888_s2] ss:$0 sm:$0xff]  ;;  %v141_v26 = vld [vmem:[%s892_s6 + $0x48] sm:$0xff]  ;;  %v142_v28 = vld [vmem:[%s892_s6 + $0x50] sm:$0xff] }
  0x19   :  { %v140_v25 = vld [vmem:[%s892_s6 + $0x40] sm:$0xff]  ;;  %v143_v29 = vld [vmem:[%s892_s6 + $0x58] sm:$0xff]  ;;  %v145_v32 = vld [vmem:[%s892_s6 + $0x68] sm:$0xff] }
  0x1a   :  { %v563_v27 = vpack.c.bf16 %v141_v26, %v140_v25  ;;  %v566_v30 = vpack.c.bf16 %v143_v29, %v142_v28  ;;  %v144_v31 = vld [vmem:[%s892_s6 + $0x60] sm:$0xff]  ;;  %v146_v34 = vld [vmem:[%s892_s6 + $0x70] sm:$0xff]  ;;  %v147_v35 = vld [vmem:[%s892_s6 + $0x78] sm:$0xff] }
  0x1b   :  { %549 = vmatpush3.bf16.msra.mxu1 %v548_v7  ;;  %v569_v33 = vpack.c.bf16 %v145_v32, %v144_v31  ;;  %v572_v36 = vpack.c.bf16 %v147_v35, %v146_v34  ;;  %v220_v37 = vld [vmem:[#allocation2] sm:$0xff]  ;;  %v221_v38 = vld [vmem:[#allocation2 + $0x8] sm:$0xff]  ;;  %v222_v39 = vld [vmem:[#allocation2 + $0x10] sm:$0xff] }
  0x1c   :  { %550 = vmatprep.subr.bf16.mxu1 %v666_v0  ;;  %v575_v40 = vpack.c.bf16 %v221_v38, %v220_v37  ;;  %v223_v41 = vld [vmem:[#allocation2 + $0x18] sm:$0xff]  ;;  %v295_v43 = vld [vmem:[%s889_s3] sm:$0xff]  ;;  %v296_v44 = vld [vmem:[%s889_s3 + $0x8] sm:$0xff] }
  0x1d   :  { %v578_v42 = vpack.c.bf16 %v223_v41, %v222_v39  ;;  %v581_v45 = vpack.c.bf16 %v296_v44, %v295_v43  ;;  %v297_v46 = vld [vmem:[%s889_s3 + $0x10] sm:$0xff]  ;;  %v298_v47 = vld [vmem:[%s889_s3 + $0x18] sm:$0xff]  ;;  %v299_v49 = vld [vmem:[%s889_s3 + $0x20] sm:$0xff] }
  0x1e   :  { %461 = vmatmul.mubr.msk.f32.vlgmr.msra.gmra.mrb[0].mxu1 %vm53_vm1, %v744_v8  ;;  %576 = vmatpush3.bf16.msra.mxu0 %v575_v40  ;;  %v584_v48 = vpack.c.bf16 %v298_v47, %v297_v46  ;;  %v300_v50 = vld [vmem:[%s889_s3 + $0x28] sm:$0xff]  ;;  %v301_v52 = vld [vmem:[%s889_s3 + $0x30] sm:$0xff]  ;;  %v302_v53 = vld [vmem:[%s889_s3 + $0x38] sm:$0xff] }
  0x1f   :  { %495 = vmatprep.mubr.msk.f32.mxu1 %vm667_vm0, %v668_v1  ;;  %552 = vmatpush3.bf16.msra.mxu1 %v551_v12  ;;  %v587_v51 = vpack.c.bf16 %v300_v50, %v299_v49  ;;  %v590_v54 = vpack.c.bf16 %v302_v53, %v301_v52  ;;  %v303_v59 = vld [vmem:[%s889_s3 + $0x40] sm:$0xff]  ;;  %v304_v60 = vld [vmem:[%s889_s3 + $0x48] sm:$0xff]  ;;  %v305_v62 = vld [vmem:[%s889_s3 + $0x50] sm:$0xff] }
  0x20   :  { %553 = vmatprep.subr.bf16.mxu1 %v666_v0  ;;  %577 = vmatprep.subr.bf16.mxu0 %v666_v0  ;;  %v593_v61 = vpack.c.bf16 %v304_v60, %v303_v59  ;;  %v306_v63 = vld [vmem:[%s889_s3 + $0x58] sm:$0xff]  ;;  %v307_v2 = vld [vmem:[%s889_s3 + $0x60] sm:$0xff]  ;;  %v308_v3 = vld [vmem:[%s889_s3 + $0x68] sm:$0xff] }
  0x21   :  { %v599_v4 = vpack.c.bf16 %v308_v3, %v307_v2  ;;  %v309_v5 = vld [vmem:[%s889_s3 + $0x70] sm:$0xff]  ;;  %v310_v6 = vld [vmem:[%s889_s3 + $0x78] sm:$0xff]  ;;  %s637_s3 = scalar_lea.vmem %s396_s12, 128 }
  0x22   :  { %579 = vmatpush3.bf16.msra.mxu0 %v578_v42  ;;  %v602_v7 = vpack.c.bf16 %v310_v6, %v309_v5  ;;  %p638_p8 = scmp.ne.s32.totalorder %s396_s12, %s637_s3  ;;  %p643_p10 = scmp.lt.s32.totalorder %s637_s3, %s637_s3 }
  0x23   :  { %555 = vmatpush3.bf16.msra.mxu1 %v554_v14  ;;  %580 = vmatprep.subr.bf16.mxu0 %v666_v0 }
  0x24   :  { %556 = vmatprep.subr.bf16.mxu1 %v666_v0  ;;  %p644_p11 = por %p643_p10, %p642_p9 }
  0x25   :  { %507 = vmatmul.mubr.msk.f32.vlgmr.msra.gmra.mrb[0].mxu0 %vm53_vm1, %v744_v8 }
  0x26   :  { %582 = vmatpush3.bf16.msra.mxu0 %v581_v45  ;;  %541 = vmatprep.mubr.msk.f32.mxu0 %vm667_vm0, %v668_v1  ;;  %v596_v1 = vpack.c.bf16 %v306_v63, %v305_v62  ;;  %p645_p12 = pnand %p644_p11, %p638_p8 }
  0x27   :  { %558 = vmatpush3.bf16.msra.mxu1 %v557_v17  ;;  %583 = vmatprep.subr.bf16.mxu0 %v666_v0 }
  0x28   :  { %559 = vmatprep.subr.bf16.mxu1 %v666_v0 }
  0x2a   :  { %585 = vmatpush3.bf16.msra.mxu0 %v584_v48 }
  0x2b   :  { %561 = vmatpush3.bf16.msra.mxu1 %v560_v20  ;;  %586 = vmatprep.subr.bf16.mxu0 %v666_v0 }
  0x2c   :  { %562 = vmatprep.subr.bf16.mxu1 %v666_v0 }
  0x2e   :  { %588 = vmatpush3.bf16.msra.mxu0 %v587_v51 }
  0x2f   :  { %564 = vmatpush3.bf16.msra.mxu1 %v563_v27  ;;  %589 = vmatprep.subr.bf16.mxu0 %v666_v0 }
  0x30   :  { %565 = vmatprep.subr.bf16.mxu1 %v666_v0 }
  0x32   :  { %591 = vmatpush3.bf16.msra.mxu0 %v590_v54 }
  0x33   :  { %567 = vmatpush3.bf16.msra.mxu1 %v566_v30  ;;  %592 = vmatprep.subr.bf16.mxu0 %v666_v0 }
  0x34   :  { %568 = vmatprep.subr.bf16.mxu1 %v666_v0 }
  0x36   :  { %594 = vmatpush3.bf16.msra.mxu0 %v593_v61 }
  0x37   :  { %570 = vmatpush3.bf16.msra.mxu1 %v569_v33  ;;  %595 = vmatprep.subr.bf16.mxu0 %v666_v0 }
  0x38   :  { %571 = vmatprep.subr.bf16.mxu1 %v666_v0 }
  0x3a   :  { %597 = vmatpush3.bf16.msra.mxu0 %v596_v1 }
  0x3b   :  { %573 = vmatpush3.bf16.msra.mxu1 %v572_v36  ;;  %598 = vmatprep.subr.bf16.mxu0 %v666_v0 }
  0x3e   :  { %600 = vmatpush3.bf16.msra.mxu0 %v599_v4 }
  0x3f   :  { %601 = vmatprep.subr.bf16.mxu0 %v666_v0  ;;  %v407_v0 = vld [vmem:[%s890_s4] ss:$0 sm:$0xff] }
  0x42   :  { %603 = vmatpush3.bf16.msra.mxu0 %v602_v7 }
  0xf1   :  { %v123_v22 = vpop.f32.mrb[0].mxu1 }
  0xf2   :  { %v124_v23 = vadd.f32 %v404_v21, %v123_v22  ;;  %v462_v24 = vpop.f32.mrb[1].mxu1 }
  0xf4   :  { %127 = vmax.xlane.f32.xlu0 %v124_v23 }
  0xf8   :  { %v290_v8 = vpop.f32.mrb[0].mxu0 }
  0xf9   :  { %v508_v9 = vpop.f32.mrb[1].mxu0 }
 0x181   :  { %v128_v55 = vpop.xlane.xlu0 %127 }
 0x182   :  { %v129_v56 = vsub.f32 %v124_v23, %v128_v55 }
 0x184   :  { %v130_v57 = vmul.f32 1.442695, %v129_v56 }
 0x186   :  { %611 = vpow2.f32 %v130_v57 }
 0x190   :  { %v612_v58 = vpop.eup %611 }
 0x191   :  { %496 = vmatmul.mubr.f32.vlgmr.msra.gmra.mrb[2].mxu1 %v612_v58 }
 0x264   :  { %v214_v10 = vpop.f32.mrb[2].mxu1 }
 0x265   :  { %613 = vrcp.f32 %v214_v10  ;;  %v497_v11 = vpop.f32.mrb[3].mxu1 }
 0x26f   :  { %v614_v12 = vpop.eup %613 }
 0x270   :  { %v219_v13 = vmul.f32 %v614_v12, %v612_v58 }
 0x272   :  { %v294_v14 = vmul.f32 %v290_v8, %v219_v13 }
 0x274   :  { %542 = vmatmul.mubr.f32.vlgmr.msra.gmra.mrb[2].mxu0 %v294_v14 }
 0x347   :  { %v384_v15 = vpop.f32.mrb[2].mxu0 }
 0x348   :  { %v385_v16 = vadd.f32 %v407_v0, %v384_v15  ;;  %v543_v17 = vpop.f32.mrb[3].mxu0 }
 0x34a   :  { %388 = vst.msk [vmem:[#allocation5] sm:$0xff] %vm53_vm1, %v385_v16 }
 0x34b   :  { %648 = shalt.err (!%p645_p12)
}
 0x34c   :  { %s649_s15 = scalar_lea.hbm %s893_s7, 128 }
 0x34d   :  { %p650_p13 = scmp.ne.s32.totalorder %s893_s7, %s649_s15  ;;  %p653_p0 = scmp.lt.u32.totalorder %s649_s15, %s893_s7 }
 0x34f   :  { %p655_p1 = pnand %p653_p0, %p650_p13 }
 0x351   :  { %658 = shalt.err (!%p655_p1)
}
 0x352   :  { %398 = dma.vmem_to_hbm [thread:$0]  %s396_s12, 128, %s893_s7, [#allocation4]  }
 0x353   :  { %661 = dma.done.wait [#allocation4], 128  }
 0x354   :  { %662 = vsyncadd [#allocation4], 4294967168 }
 0x355   :  { %402 = vsyncpa [#allocation3], 1 }
 0x356   :  { %403 = vsyncpa [#allocation4], 1 }

</bundles_post_ra>
